<compile_context>
chip_gen: v7x
topology: tpu7x:2x2x1
jax: 0.10.0
libtpu: 0.0.40
codegen_flags: <defaults>
</compile_context>

<pallas_src>
from functools import partial

import jax
import jax.numpy as jnp
from jax.experimental import pallas as pl
from jax.experimental.pallas import tpu as pltpu

LEAKY_SLOPE = 0.2
IN_EPS = 1e-5


# ---------------------------------------------------------------------------
# Shared epilogue: bias already added; optional InstanceNorm + LeakyReLU, f32.
# ---------------------------------------------------------------------------
def _epilogue(x, normalize, activate, inv_p):
    if normalize:
        # InstanceNorm2d(affine=False): per-channel over the spatial axis,
        # biased variance, eps=1e-5.  One-pass stats (sum + sum-of-squares).
        s = jnp.sum(x, axis=0, keepdims=True)
        ss = jnp.sum(x * x, axis=0, keepdims=True)
        mean = s * inv_p
        var = jnp.maximum(ss * inv_p - mean * mean, 0.0)
        x = (x - mean) * jax.lax.rsqrt(var + IN_EPS)       # rsqrt -> EUP slot
    if activate:
        x = jnp.where(x >= 0, x, LEAKY_SLOPE * x)          # LeakyReLU(0.2)
    return x


# ---------------------------------------------------------------------------
# Kernel A: whole contraction in one step, grid = (batch,).
#   p_ref : (1, P, K)   bf16   im2col patches of this image (P = Ho*Wo)
#   w_ref : (K, Cout)   bf16   reshaped conv weight (constant block -> 1 DMA)
#   b_ref : (1, Cout)   f32    conv bias
#   o_ref : (1, P, Cout)       output (bf16 hidden layers, f32 last layer)
# ---------------------------------------------------------------------------
def _conv_block_kernel_single(p_ref, w_ref, b_ref, o_ref, *,
                              normalize, activate, inv_p):
    x = jnp.dot(p_ref[0], w_ref[...],
                preferred_element_type=jnp.float32) + b_ref[...]
    x = _epilogue(x, normalize, activate, inv_p)
    o_ref[...] = x[None].astype(o_ref.dtype)


# ---------------------------------------------------------------------------
# Kernel B: K-tiled accumulation, grid = (batch, K-tiles), reduction innermost.
#   acc_ref : (P, Cout) f32 VMEM accumulator, persistent across K tiles.
# ---------------------------------------------------------------------------
def _conv_block_kernel_multi(p_ref, w_ref, b_ref, o_ref, acc_ref, *,
                             normalize, activate, inv_p):
    k = pl.program_id(1)

    @pl.when(k == 0)
    def _():
        acc_ref[...] = jnp.zeros_like(acc_ref)

    # bf16 operands on the MXU, f32 accumulation.
    acc_ref[...] += jnp.dot(p_ref[0], w_ref[...],
                            preferred_element_type=jnp.float32)

    @pl.when(k == pl.num_programs(1) - 1)
    def _():
        x = _epilogue(acc_ref[...] + b_ref[...], normalize, activate, inv_p)
        o_ref[...] = x[None].astype(o_ref.dtype)


def _pick_tk(K, P, c_out, budget_bytes=8 << 20):
    """Largest MXU-aligned (multiple of 128) K tile dividing K whose
    double-buffered bf16 patch + weight blocks stay within budget."""
    if K % 128 != 0:
        return K
    cands = sorted({c for c in (8192, 4096, 2048, 1024, 512, 256, 128)
                    if K % c == 0} | {K}, reverse=True)
    for c in cands:
        if 2 * (P * c + c * c_out) * 2 <= budget_bytes:
            return c
    return 128


def _vmem_limit_bytes(P, tk, c_out):
    """Right-sized scoped-VMEM request: per-step footprint + headroom,
    floored at 16 MiB, capped at 48 MiB (fits v7x's 64 MiB physical VMEM)."""
    p_pad = -(-P // 8) * 8
    patches = 2 * p_pad * tk * 2          # bf16 patch tile, double-buffered
    weights = 2 * tk * c_out * 2          # bf16 weight tile, double-buffered
    bias = 2 * 8 * max(128, c_out) * 4    # f32, padded to (8,128) tiles
    out = 2 * p_pad * c_out * 4           # output block, double-buffered
    acc = p_pad * c_out * 4               # accumulator scratch (worst case)
    total = patches + weights + bias + out + acc
    total = int(1.5 * total) + (2 << 20)  # headroom for epilogue temporaries
    return int(min(48 * 1024 * 1024, max(16 * 1024 * 1024, total)))


def conv_block(patches, w_mat, bias, *, normalize, activate,
               out_dtype=jnp.bfloat16):
    """patches: (N, P, K), w_mat: (K, Cout), bias: (Cout,) -> (N, P, Cout)."""
    N, P, K = patches.shape
    c_out = w_mat.shape[1]
    tk = _pick_tk(K, P, c_out)
    nk = K // tk

    args = (patches.astype(jnp.bfloat16),
            w_mat.astype(jnp.bfloat16),
            bias.reshape(1, c_out).astype(jnp.float32))
    out_shape = jax.ShapeDtypeStruct((N, P, c_out), out_dtype)
    cparams = pltpu.CompilerParams(
        dimension_semantics=("parallel",) if nk == 1
        else ("parallel", "arbitrary"),
        vmem_limit_bytes=_vmem_limit_bytes(P, tk, c_out),
    )

    if nk == 1:
        # Single contraction step: no accumulator, weight block index constant
        # -> weights DMA'd once and kept resident across the whole batch.
        kern = partial(_conv_block_kernel_single, normalize=normalize,
                       activate=activate, inv_p=1.0 / P)
        return pl.pallas_call(
            kern,
            out_shape=out_shape,
            grid=(N,),
            in_specs=[
                pl.BlockSpec((1, P, K), lambda n: (n, 0, 0)),
                pl.BlockSpec((K, c_out), lambda n: (0, 0)),
                pl.BlockSpec((1, c_out), lambda n: (0, 0)),
            ],
            out_specs=pl.BlockSpec((1, P, c_out), lambda n: (n, 0, 0)),
            compiler_params=cparams,
        )(*args)

    kern = partial(_conv_block_kernel_multi, normalize=normalize,
                   activate=activate, inv_p=1.0 / P)
    return pl.pallas_call(
        kern,
        out_shape=out_shape,
        grid=(N, nk),
        in_specs=[
            pl.BlockSpec((1, P, tk), lambda n, k: (n, 0, k)),
            pl.BlockSpec((tk, c_out), lambda n, k: (k, 0)),
            pl.BlockSpec((1, c_out), lambda n, k: (0, 0)),
        ],
        out_specs=pl.BlockSpec((1, P, c_out), lambda n, k: (n, 0, 0)),
        scratch_shapes=[pltpu.VMEM((P, c_out), jnp.float32)],
        compiler_params=cparams,
    )(*args)


# ---------------------------------------------------------------------------
# Plain-JAX glue: im2col, weight reshaping, parameter init, full forward.
# ---------------------------------------------------------------------------
def im2col(x, k, stride, pad):
    """x: (N, H, W, C) -> patches (N, Ho*Wo, k*k*C) in (kh, kw, C) order."""
    x = jnp.pad(x, ((0, 0), (pad, pad), (pad, pad), (0, 0)))
    N, H, W, C = x.shape
    Ho = (H - k) // stride + 1
    Wo = (W - k) // stride + 1
    cols = []
    for i in range(k):
        for j in range(k):
            cols.append(x[:, i::stride, j::stride, :][:, :Ho, :Wo, :])
    p = jnp.stack(cols, axis=3)                      # (N, Ho, Wo, k*k, C)
    return p.reshape(N, Ho * Wo, k * k * C), Ho, Wo


def _w_to_mat(w, c_in_pad=None):
    """PyTorch conv weight (Cout, Cin, kh, kw) -> (kh*kw*Cin_pad, Cout),
    matching im2col's (kh, kw, Cin) patch ordering."""
    c_out, c_in, _, _ = w.shape
    if c_in_pad is not None and c_in_pad > c_in:
        w = jnp.pad(w, ((0, 0), (0, c_in_pad - c_in), (0, 0), (0, 0)))
    return jnp.transpose(w, (2, 3, 1, 0)).reshape(-1, c_out).astype(jnp.float32)


def _pad_channels(x, multiple=8):
    c = x.shape[-1]
    extra = (-c) % multiple
    if extra:
        x = jnp.pad(x, ((0, 0), (0, 0), (0, 0), (0, extra)))
    return x


def init_conv(key, c_in, c_out, k=4):
    kw, kb = jax.random.split(key)
    fan_in = c_in * k * k
    bound = 1.0 / (fan_in ** 0.5)
    w = jax.random.uniform(kw, (c_out, c_in, k, k), jnp.float32, -bound, bound)
    b = jax.random.uniform(kb, (c_out,), jnp.float32, -bound, bound)
    return w, b


def init_discriminator_params(key, channels):
    keys = jax.random.split(key, 5)
    return [
        init_conv(keys[0], channels, 64),
        init_conv(keys[1], 64, 128),
        init_conv(keys[2], 128, 256),
        init_conv(keys[3], 256, 512),
        init_conv(keys[4], 512, 1),
    ]


def discriminator_forward(img_nchw, params):
    # NCHW -> NHWC
    x = jnp.transpose(img_nchw, (0, 2, 3, 1)).astype(jnp.float32)
    N = x.shape[0]

    # Zero-pad Cin (3 -> 8) so the first layer's K = 4*4*8 = 128 is a fully
    # utilized MXU contraction depth (no numerical change).
    x = _pad_channels(x, 8)
    c_in_pad = x.shape[-1]
    x = x.astype(jnp.bfloat16)     # matmul operands bf16; accumulation stays f32

    # 4 discriminator blocks: Conv(k=4, s=2, p=1) [+InstanceNorm] + LeakyReLU(0.2)
    for layer_idx, normalize in enumerate([False, True, True, True]):
        w, b = params[layer_idx]
        c_out = w.shape[0]
        w_mat = _w_to_mat(w, c_in_pad if layer_idx == 0 else None)
        p, Ho, Wo = im2col(x, k=4, stride=2, pad=1)
        y = conv_block(p, w_mat, b, normalize=normalize, activate=True,
                       out_dtype=jnp.bfloat16)
        x = y.reshape(N, Ho, Wo, c_out)

    # ZeroPad2d((left=1, right=0, top=1, bottom=0))
    x = jnp.pad(x, ((0, 0), (1, 0), (1, 0), (0, 0)))

    # Final Conv2d(512, 1, kernel_size=4, stride=1, padding=1).
    # Pad Cout 1 -> 128 with zero columns so the kernel output is lane-dense.
    w, b = params[4]
    w_mat = jnp.pad(_w_to_mat(w), ((0, 0), (0, 127)))
    b_pad = jnp.pad(b, ((0, 127),))
    p, Ho, Wo = im2col(x, k=4, stride=1, pad=1)
    y = conv_block(p, w_mat, b_pad, normalize=False, activate=False,
                   out_dtype=jnp.float32)
    out = y[:, :, :1].reshape(N, Ho, Wo, 1)

    # Back to NCHW to match the PyTorch output convention.
    return jnp.transpose(out, (0, 3, 1, 2))


if __name__ == "__main__":
    key = jax.random.PRNGKey(0)
    k_img, k_par = jax.random.split(key)

    batch, channels, height, width = 2, 3, 32, 32
    img = jax.random.normal(k_img, (batch, channels, height, width), jnp.float32)

    params = init_discriminator_params(k_par, channels)

    out = discriminator_forward(img, params)
    out = jax.block_until_ready(out)

    # Expected: 32 -> 16 -> 8 -> 4 -> 2 -> zeropad 3 -> 2  =>  (2, 1, 2, 2)
    assert out.shape == (batch, 1, 2, 2), out.shape
    assert bool(jnp.all(jnp.isfinite(out)))
    print("KERNEL_OK")
</pallas_src>

<mosaic_0001>
module attributes {stable_mosaic.version = 11 : i64} {
  func.func @_conv_block_kernel_single(%arg0: i32, %arg1: memref<1x256x128xbf16, #tpu.memory_space<vmem>>, %arg2: memref<128x64xbf16, #tpu.memory_space<vmem>>, %arg3: memref<1x64xf32, #tpu.memory_space<vmem>>, %arg4: memref<1x256x64xbf16, #tpu.memory_space<vmem>>) attributes {dimension_semantics = [#tpu.dimension_semantics<parallel>], iteration_bounds = array<i64: 2>, scalar_prefetch = 0 : i64, scratch_operands = 0 : i64, tpu.core_type = #tpu.core_type<tc>, window_params = [{transform_indices = @transform_0, window_bounds = array<i64: 1, 256, 128>}, {pipeline_mode = #tpu.pipeline_mode<synchronous>, transform_indices = @transform_1, window_bounds = array<i64: 128, 64>}, {pipeline_mode = #tpu.pipeline_mode<synchronous>, transform_indices = @transform_2, window_bounds = array<i64: 1, 64>}, {transform_indices = @transform_3, window_bounds = array<i64: 1, 256, 64>}]} {
    %c0 = arith.constant 0 : index
    %c0_0 = arith.constant 0 : index
    %c0_1 = arith.constant 0 : index
    %0 = vector.load %arg1[%c0, %c0_0, %c0_1] : memref<1x256x128xbf16, #tpu.memory_space<vmem>>, vector<1x256x128xbf16>
    %1 = vector.shape_cast %0 : vector<1x256x128xbf16> to vector<256x128xbf16>
    %c0_2 = arith.constant 0 : index
    %c0_3 = arith.constant 0 : index
    %2 = vector.load %arg2[%c0_2, %c0_3] : memref<128x64xbf16, #tpu.memory_space<vmem>>, vector<128x64xbf16>
    %cst = arith.constant dense<0.000000e+00> : vector<256x64xf32>
    %3 = tpu.matmul %1, %2, %cst {dimension_numbers = #tpu.dot_dimension_numbers<[1], [0], [0], [1], [0, 0, 1, 1], [], []>} : vector<256x128xbf16>, vector<128x64xbf16>, vector<256x64xf32> -> vector<256x64xf32>
    %c0_4 = arith.constant 0 : index
    %c0_5 = arith.constant 0 : index
    %4 = vector.load %arg3[%c0_4, %c0_5] : memref<1x64xf32, #tpu.memory_space<vmem>>, vector<1x64xf32>
    %5 = vector.broadcast %4 : vector<1x64xf32> to vector<256x64xf32>
    %6 = arith.addf %3, %5 : vector<256x64xf32>
    %cst_6 = arith.constant 0.000000e+00 : f32
    %7 = vector.broadcast %cst_6 : f32 to vector<256x64xf32>
    %8 = arith.cmpf oge, %6, %7 : vector<256x64xf32>
    %cst_7 = arith.constant 2.000000e-01 : f32
    %9 = vector.broadcast %cst_7 : f32 to vector<256x64xf32>
    %10 = arith.mulf %9, %6 : vector<256x64xf32>
    %11 = arith.select %8, %6, %10 : vector<256x64xi1>, vector<256x64xf32>
    %12 = vector.shape_cast %11 : vector<256x64xf32> to vector<1x256x64xf32>
    %13 = arith.truncf %12 : vector<1x256x64xf32> to vector<1x256x64xbf16>
    %c0_8 = arith.constant 0 : index
    %c0_9 = arith.constant 0 : index
    %c0_10 = arith.constant 0 : index
    %14 = vector.load %arg4[%c0_8, %c0_9, %c0_10] : memref<1x256x64xbf16, #tpu.memory_space<vmem>>, vector<1x256x64xbf16>
    tpu.vector_store %arg4[%c0_8, %c0_9, %c0_10], %13 {strides = array<i32>} : memref<1x256x64xbf16, #tpu.memory_space<vmem>>, vector<1x256x64xbf16>,
    return
  }
  func.func @transform_0(%arg0: i32) -> (i32, i32, i32) {
    %c0_i32 = arith.constant 0 : i32
    %c0_i32_0 = arith.constant 0 : i32
    %c0_i32_1 = arith.constant 0 : i32
    return %arg0, %c0_i32, %c0_i32_0 : i32, i32, i32
  }
  func.func @transform_1(%arg0: i32) -> (i32, i32) {
    %c0_i32 = arith.constant 0 : i32
    %c0_i32_0 = arith.constant 0 : i32
    %c0_i32_1 = arith.constant 0 : i32
    return %c0_i32, %c0_i32_0 : i32, i32
  }
  func.func @transform_2(%arg0: i32) -> (i32, i32) {
    %c0_i32 = arith.constant 0 : i32
    %c0_i32_0 = arith.constant 0 : i32
    %c0_i32_1 = arith.constant 0 : i32
    return %c0_i32, %c0_i32_0 : i32, i32
  }
  func.func @transform_3(%arg0: i32) -> (i32, i32, i32) {
    %c0_i32 = arith.constant 0 : i32
    %c0_i32_0 = arith.constant 0 : i32
    %c0_i32_1 = arith.constant 0 : i32
    return %arg0, %c0_i32, %c0_i32_0 : i32, i32, i32
  }
}

</mosaic_0001>

<bundles_post_ra>
// kernel: tpu_custom_call.1
= control target key start
LH: loop header
LB: loop body
LE: loop exit
PB: predicated region body
PF: predicated region fallthrough
CT: control target
= control target key end

     0   :  { %8 = vsyncpa [#allocation3], 0  ;;  %s1475_s0 = inlined_call_operand.hbm [shape: bf16[2,256,128], index: 0, kind: input, shape index: {}]   ;;  %s1476_s1 = inlined_call_operand.vmem [shape: bf16[128,64], index: 1, kind: input, shape index: {}]   ;;  %s1477_s2 = inlined_call_operand.vmem [shape: f32[1,64], index: 2, kind: input, shape index: {}]   ;;  %s1478_s3 = inlined_call_operand.vmem [shape: bf16[2,256,64], index: 3, kind: output, shape index: {}]  }
   0x1   :  { %10 = vsyncpa [#allocation3 + $0x1], 0  ;;  %s1221_s12 = smov 0   ;;  %s1223_s13 = smov 0  }
   0x2   :  { %s1225_s14 = smov 0   ;;  %s1227_s15 = smov 0  }
   0x3 LB: > { %s1240_s16 = sadd.s32 4294967295, %s1196_s15   ;;  %s1243_s17 = sadd.s32 1, %s1196_s15   ;;  %s1196_s15 = sphi %s1227_s15, %s1485_s15   ;;  %s1192_s14 = sphi %s1225_s14, %s1484_s14   ;;  %s1188_s13 = sphi %s1223_s13, %s1483_s13   ;;  %s1184_s12 = sphi %s1221_s12, %s1482_s12  }
   0x4   : > { %s20_s18 = ssub.s32 %s1196_s15, %s1243_s17  ;;  %s23_s19 = sadd.s32 1, %s1192_s14 }
   0x5   : > { %p21_p0 = scmp.eq.s32.totalorder %s20_s18, 0  ;;  %p30_p1 = scmp.ne.s32.totalorder %s1192_s14, %s1188_s13 }
   0x6   : > { %p31_p2 = scmp.eq.s32.totalorder %s1196_s15, 0  ;;  %p36_p3 = scmp.ne.s32.totalorder %s1188_s13, %s1184_s12 }
   0x7   : > { %s1253_s20 = scalar_select %p21_p0, %s1192_s14, %s23_s19  }
   0x8   : > { %p32_p4 = por %p31_p2, %p30_p1  ;;  %p37_p5 = scmp.eq.s32.totalorder %s1240_s16, 0 }
   0x9   : > { %p1073_p6 = scmp.lt.s32.totalorder %s1196_s15, 2  ;;  %s134_s22 = sand.u32 1, %s1192_s14  }
   0xa   : > { %p1257_p7 = por %p37_p5, %p36_p3  ;;  %s879_s23 = sshll.u32 %s134_s22, 7 }
   0xb   : > { %s945_s24 = sshll.u32 %s1196_s15, 11  ;;  %s138_s28 = scalar_lea.vmem [#allocation2], %s879_s23 }
   0xc   : > { %s1266_s27 = scalar_lea.hbm %s1475_s0, %s945_s24  ;;  %s145_s29 = sshll.u32 %s138_s28, 4  ;;  %s1268_s29 = int_to_ptr.vmem [resolvable:$true] %s145_s29 }
   0xd   : > { %p1270_p8 = pnand %p1073_p6, %p32_p4  ;;  %s1275_s4 = scalar_lea.sflag [#allocation3], %s134_s22 }
   0xe   : > { %s1132_s5 = scalar_lea.hbm %s1266_s27, 2048  ;;  %s1137_s8 = scalar_lea.hbm %s1475_s0, 4096 }
   0xf   : > { %p1133_p10 = scmp.ne.s32.totalorder %s1266_s27, %s1132_s5  ;;  %p1134_p11 = pneg %p1270_p8 }
  0x10   : > { %p1138_p0 = scmp.lt.u32.totalorder %s1266_s27, %s1475_s0  ;;  %p1139_p1 = scmp.lt.u32.totalorder %s1137_s8, %s1132_s5 }
  0x11   : > { %p1135_p12 = pnand %p1134_p11, %p1133_p10  ;;  %p1141_p3 = scmp.lt.u32.totalorder %s1132_s5, %s1266_s27 }
  0x12   : > { %p1140_p2 = por %p1139_p1, %p1138_p0 }
  0x13   : > { %p1136_p13 = pneg %p1135_p12 }
  0x14   : > { %p1142_p4 = por %p1141_p3, %p1140_p2 }
  0x16   : > { %p1143_p5 = pnand %p1142_p4, %p1136_p13 }
  0x18   : > { %1146 = shalt.err (!%p1143_p5)
}
  0x19   : > { %s1147_s11 = scalar_lea.vmem %s1268_s29, 2048  ;;  %s1198_s12 = smov [#allocation2]  }
  0x1a   : > { %p1148_p6 = scmp.ne.s32.totalorder %s1268_s29, %s1147_s11  ;;  %s1152_s18 = sshll.u32 %s1198_s12, 4  ;;  %s1153_s18 = int_to_ptr.vmem [resolvable:$false] %s1152_s18 }
  0x1b   : > { %s1154_s19 = scalar_lea.vmem %s1153_s18, 4096  ;;  %p1155_p9 = scmp.lt.s32.totalorder %s1268_s29, %s1153_s18 }
  0x1c   : > { %p1150_p10 = pnand %p1148_p6, %p1134_p11  ;;  %p1156_p0 = scmp.lt.s32.totalorder %s1154_s19, %s1147_s11 }
  0x1e   : > { %p1151_p12 = pneg %p1150_p10  ;;  %p1157_p1 = por %p1156_p0, %p1155_p9 }
  0x20   : > { %p1158_p2 = pnand %p1157_p1, %p1151_p12 }
  0x22   : > { %1161 = shalt.err (!%p1158_p2)
}
  0x23   : > { %s1199_s22 = smov 64   ;;  %s1200_s23 = smov 4  }
  0x24   : > { %1072 = dma.hbm_to_vmem [thread:$0]  (!%p1270_p8), %s1266_s27, 2048, %s1268_s29, %s1275_s4, %s1199_s22, %s1199_s22, %s1200_s23  }
  0x25   : > { %p153_p11 = scmp.lt.s32.totalorder %s1196_s15, 3  ;;  %p1481_p13 = scmp.ge.s32.totalorder %s1196_s15, 1 }
  0x27   : > { %p154_p3 = pnand %p1481_p13, %p153_p11 }
  0x28   : > { %s159_s24 = sand.u32 (!%p154_p3), 1, %s1188_s13  }
  0x29   : > { %157 = sbr.rel (%p154_p3) target bundleno = 340 (0x154), region = 32  ;;  %s883_s25 = sshll.u32 (!%p154_p3), %s159_s24, 7 }
  0x2a   : > { %s160_s26 = scalar_lea.sflag (!%p154_p3), [#allocation3], %s159_s24  ;;  %s1307_s28 = scalar_lea.vmem (!%p154_p3), [#allocation2], %s883_s25 }
  0x30   : > { %1179 = dma.done.wait (%p1257_p7), %s160_s26, 2048  }
  0x31   : > { %1181 = vsyncadd (%p1257_p7), %s160_s26, 4294965248  ;;  %v1108_v0 = vld [vmem:[%s1476_s1] sm:$0xff]   ;;  %v1109_v1 = vld [vmem:[%s1476_s1 + $0x8] sm:$0xff]   ;;  %p186_p7 = scmp.lt.s32.totalorder %s1240_s16, 1  ;;  %vm776_vm0 = vcmask 519168  }
  0x32   : > { %1003 = vmatprep.subr.bf16.mxu0 %v1108_v0  ;;  %1051 = vmatprep.subr.bf16.mxu1 %v1108_v0  ;;  %v1110_v2 = vld [vmem:[%s1476_s1 + $0x10] sm:$0xff]   ;;  %v1111_v3 = vld [vmem:[%s1476_s1 + $0x18] sm:$0xff]   ;;  %v1116_v4 = vld [vmem:[%s1307_s28] sm:$0xff]  }
  0x33   : > { %1004 = vmatpush3.bf16.msra.mxu0 %v1108_v0  ;;  %1059 = vmatpush3.bf16.msra.mxu1 %v1108_v0  ;;  %v1117_v5 = vld [vmem:[%s1307_s28 + $0x40] sm:$0xff]   ;;  %v1113_v7 = vld [vmem:[%s1476_s1 + $0x28] sm:$0xff]   ;;  %v1114_v8 = vld [vmem:[%s1476_s1 + $0x30] sm:$0xff]   ;;  %s1487_s16 = smov (!%p186_p7, %s1240_s16), 1 }
  0x34   : > { %1005 = vmatprep.subr.bf16.mxu0 %v1109_v1  ;;  %1052 = vmatprep.subr.bf16.mxu1 %v1109_v1  ;;  %v1112_v6 = vld [vmem:[%s1476_s1 + $0x20] sm:$0xff]   ;;  %v1115_v9 = vld [vmem:[%s1476_s1 + $0x38] sm:$0xff]   ;;  %v1118_v10 = vld [vmem:[%s1307_s28 + $0x8] sm:$0xff]   ;;  %s946_s24 = sshll.u32 %s1487_s16, 7 }
  0x35   : > { %1019 = vmatprep.mubr.bf16.mxu0 %v1116_v4  ;;  %1035 = vmatprep.mubr.bf16.mxu1 %v1117_v5  ;;  %v1119_v11 = vld [vmem:[%s1307_s28 + $0x48] sm:$0xff]   ;;  %v1120_v12 = vld [vmem:[%s1307_s28 + $0x10] sm:$0xff]   ;;  %v1122_v14 = vld [vmem:[%s1307_s28 + $0x18] sm:$0xff]  }
  0x36   : > { %v1121_v13 = vld [vmem:[%s1307_s28 + $0x50] sm:$0xff]   ;;  %v1123_v15 = vld [vmem:[%s1307_s28 + $0x58] sm:$0xff]   ;;  %v1124_v16 = vld [vmem:[%s1307_s28 + $0x20] sm:$0xff]  }
  0x37   : > { %1006 = vmatpush3.bf16.msra.mxu0 %v1109_v1  ;;  %1060 = vmatpush3.bf16.msra.mxu1 %v1109_v1  ;;  %v1125_v17 = vld [vmem:[%s1307_s28 + $0x60] sm:$0xff]   ;;  %v1126_v18 = vld [vmem:[%s1307_s28 + $0x28] sm:$0xff]   ;;  %v1128_v20 = vld [vmem:[%s1307_s28 + $0x30] sm:$0xff]  }
  0x38   : > { %1007 = vmatprep.subr.bf16.mxu0 %v1110_v2  ;;  %1053 = vmatprep.subr.bf16.mxu1 %v1110_v2  ;;  %v1127_v19 = vld [vmem:[%s1307_s28 + $0x68] sm:$0xff]   ;;  %v1129_v21 = vld [vmem:[%s1307_s28 + $0x70] sm:$0xff]   ;;  %v1130_v22 = vld [vmem:[%s1307_s28 + $0x38] sm:$0xff]  }
  0x39   : > { %v1131_v23 = vld [vmem:[%s1307_s28 + $0x78] sm:$0xff]   ;;  %v1358_v24 = vld [vmem:[%s1477_s2] ss:$0 sm:$0xff]  ;;  %s1367_s28 = scalar_lea.vmem %s1478_s3, %s946_s24 }
  0x3b   : > { %1008 = vmatpush3.bf16.msra.mxu0 %v1110_v2  ;;  %1061 = vmatpush3.bf16.msra.mxu1 %v1110_v2 }
  0x3c   : > { %1009 = vmatprep.subr.bf16.mxu0 %v1111_v3  ;;  %1054 = vmatprep.subr.bf16.mxu1 %v1111_v3 }
  0x3f   : > { %1010 = vmatpush3.bf16.msra.mxu0 %v1111_v3  ;;  %1062 = vmatpush3.bf16.msra.mxu1 %v1111_v3 }
  0x40   : > { %1011 = vmatprep.subr.bf16.mxu0 %v1112_v6  ;;  %1055 = vmatprep.subr.bf16.mxu1 %v1112_v6 }
  0x43   : > { %1012 = vmatpush3.bf16.msra.mxu0 %v1112_v6  ;;  %1063 = vmatpush3.bf16.msra.mxu1 %v1112_v6 }
  0x44   : > { %1013 = vmatprep.subr.bf16.mxu0 %v1113_v7  ;;  %1056 = vmatprep.subr.bf16.mxu1 %v1113_v7 }
  0x47   : > { %1014 = vmatpush3.bf16.msra.mxu0 %v1113_v7  ;;  %1064 = vmatpush3.bf16.msra.mxu1 %v1113_v7 }
  0x48   : > { %1015 = vmatprep.subr.bf16.mxu0 %v1114_v8  ;;  %1057 = vmatprep.subr.bf16.mxu1 %v1114_v8 }
  0x4b   : > { %1016 = vmatpush3.bf16.msra.mxu0 %v1114_v8  ;;  %1065 = vmatpush3.bf16.msra.mxu1 %v1114_v8 }
  0x4c   : > { %1017 = vmatprep.subr.bf16.mxu0 %v1115_v9  ;;  %1058 = vmatprep.subr.bf16.mxu1 %v1115_v9 }
  0x4f   : > { %1018 = vmatpush3.bf16.msra.mxu0 %v1115_v9  ;;  %1066 = vmatpush3.bf16.msra.mxu1 %v1115_v9 }
  0x52   : > { %1020 = vmatmul.mubr.bf16.vlgmr.msra.gmra.mrb[0].mxu0 %v1118_v10  ;;  %1036 = vmatmul.mubr.bf16.vlgmr.msra.gmra.mrb[0].mxu1 %v1119_v11 }
  0x53   : > { %1023 = vmatprep.mubr.bf16.mxu0 %v1120_v12  ;;  %1039 = vmatprep.mubr.bf16.mxu1 %v1121_v13 }
  0x5a   : > { %1024 = vmatmul.mubr.bf16.gmra.mrb[4].mxu0 %v1122_v14  ;;  %1040 = vmatmul.mubr.bf16.gmra.mrb[4].mxu1 %v1123_v15 }
  0x5b   : > { %1027 = vmatprep.mubr.bf16.mxu0 %v1124_v16  ;;  %1043 = vmatprep.mubr.bf16.mxu1 %v1125_v17 }
  0x62   : > { %1028 = vmatmul.mubr.bf16.gmra.mrb[8].mxu0 %v1126_v18  ;;  %1044 = vmatmul.mubr.bf16.gmra.mrb[8].mxu1 %v1127_v19 }
  0x63   : > { %1031 = vmatprep.mubr.bf16.mxu0 %v1128_v20  ;;  %1047 = vmatprep.mubr.bf16.mxu1 %v1129_v21 }
  0x6a   : > { %1032 = vmatmul.mubr.bf16.gmra.mrb[12].mxu0 %v1130_v22  ;;  %1048 = vmatmul.mubr.bf16.gmra.mrb[12].mxu1 %v1131_v23 }
 0x125   : > { %v1021_v25 = vpop.f32.mrb[0].mxu0  ;;  %v1037_v26 = vpop.f32.mrb[0].mxu1 }
 0x126   : > { %v434_v27 = vadd.f32 %v1021_v25, %v1358_v24  ;;  %v498_v28 = vadd.f32 %v1037_v26, %v1358_v24  ;;  %v425_v29 = vpop.f32.mrb[1].mxu0  ;;  %v489_v30 = vpop.f32.mrb[1].mxu1 }
 0x127   : > { %v426_v31 = vadd.f32 %v1358_v24, %v425_v29  ;;  %v490_v32 = vadd.f32 %v1358_v24, %v489_v30  ;;  %v1022_v33 = vpop.f32.mrb[2].mxu0  ;;  %v1038_v34 = vpop.f32.mrb[2].mxu1 }
 0x128   : > { %vm554_vm1 = vcmp.ge.f32.partialorder %v434_v27, 0.0  ;;  %v586_v35 = vmul.f32 0.2, %v434_v27  ;;  %vm570_vm2 = vcmp.ge.f32.partialorder %v498_v28, 0.0  ;;  %v602_v36 = vmul.f32 0.2, %v498_v28 }
 0x129   : > { %vm552_vm3 = vcmp.ge.f32.partialorder %v426_v31, 0.0  ;;  %v584_v37 = vmul.f32 0.2, %v426_v31  ;;  %vm568_vm4 = vcmp.ge.f32.partialorder %v490_v32, 0.0  ;;  %v600_v38 = vmul.f32 0.2, %v490_v32 }
 0x12a   : > { %v618_v39 = vsel %vm554_vm1, %v434_v27, %v586_v35  ;;  %v634_v40 = vsel %vm570_vm2, %v498_v28, %v602_v36  ;;  %v437_v41 = vadd.f32 %v1022_v33, %v1358_v24  ;;  %v501_v42 = vadd.f32 %v1038_v34, %v1358_v24  ;;  %v428_v43 = vpop.f32.mrb[3].mxu0  ;;  %v492_v44 = vpop.f32.mrb[3].mxu1 }
 0x12b   : > { %v949_v45 = vpack.c.bf16 %v618_v39, %v618_v39  ;;  %v965_v46 = vpack.c.bf16 %v634_v40, %v634_v40  ;;  %v616_v47 = vsel %vm552_vm3, %v426_v31, %v584_v37  ;;  %v632_v48 = vsel %vm568_vm4, %v490_v32, %v600_v38 }
 0x12c   : > { %v947_v49 = vpack.c.bf16 %v616_v47, %v616_v47  ;;  %v963_v50 = vpack.c.bf16 %v632_v48, %v632_v48  ;;  %vm555_vm5 = vcmp.ge.f32.partialorder %v437_v41, 0.0  ;;  %v587_v51 = vmul.f32 0.2, %v437_v41 }
 0x12d   : > { %779 = vst.msk [vmem:[%s1367_s28 + $0x8] sm:$0xf] %vm776_vm0, %v949_v45  ;;  %795 = vst.msk [vmem:[%s1367_s28 + $0x48] sm:$0xf] %vm776_vm0, %v965_v46  ;;  %vm571_vm6 = vcmp.ge.f32.partialorder %v501_v42, 0.0  ;;  %v429_v53 = vadd.f32 %v1358_v24, %v428_v43  ;;  %v493_v54 = vadd.f32 %v1358_v24, %v492_v44  ;;  %v1025_v55 = vpop.f32.mrb[4].mxu0 }
 0x12e   : > { %v603_v52 = vmul.f32 0.2, %v501_v42  ;;  %v1041_v56 = vpop.f32.mrb[4].mxu1  ;;  %777 = vst.msk [vmem:[%s1367_s28] sm:$0xf] %vm776_vm0, %v947_v49  ;;  %v619_v57 = vsel %vm555_vm5, %v437_v41, %v587_v51  ;;  %v450_v58 = vadd.f32 %v1025_v55, %v1358_v24  ;;  %v441_v60 = vpop.f32.mrb[5].mxu0 }
 0x12f   : > { %793 = vst.msk [vmem:[%s1367_s28 + $0x40] sm:$0xf] %vm776_vm0, %v963_v50  ;;  %v514_v59 = vadd.f32 %v1041_v56, %v1358_v24  ;;  %v505_v61 = vpop.f32.mrb[5].mxu1  ;;  %v950_v62 = vpack.c.bf16 %v619_v57, %v619_v57  ;;  %vm553_vm7 = vcmp.ge.f32.partialorder %v429_v53, 0.0  ;;  %v585_v0 = vmul.f32 0.2, %v429_v53 }
 0x130   : > { %v635_v63 = vsel %vm571_vm6, %v501_v42, %v603_v52  ;;  %v1026_v1 = vpop.f32.mrb[6].mxu0  ;;  %v1042_v2 = vpop.f32.mrb[6].mxu1  ;;  %vm569_vm8 = vcmp.ge.f32.partialorder %v493_v54, 0.0  ;;  %v601_v4 = vmul.f32 0.2, %v493_v54  ;;  %vm558_vm9 = vcmp.ge.f32.partialorder %v450_v58, 0.0 }
 0x131   : > { %v966_v3 = vpack.c.bf16 %v635_v63, %v635_v63  ;;  %v444_v5 = vpop.f32.mrb[7].mxu0  ;;  %v508_v6 = vpop.f32.mrb[7].mxu1  ;;  %780 = vst.msk [vmem:[%s1367_s28 + $0xc] sm:$0xf] %vm776_vm0, %v950_v62  ;;  %v617_v7 = vsel %vm553_vm7, %v429_v53, %v585_v0  ;;  %v590_v8 = vmul.f32 0.2, %v450_v58  ;;  %v442_v12 = vadd.f32 %v1358_v24, %v441_v60 }
 0x132   : > { %vm574_vm10 = vcmp.ge.f32.partialorder %v514_v59, 0.0  ;;  %v606_v9 = vmul.f32 0.2, %v514_v59  ;;  %v948_v10 = vpack.c.bf16 %v617_v7, %v617_v7  ;;  %v633_v11 = vsel %vm569_vm8, %v493_v54, %v601_v4 }
 0x133   : > { %796 = vst.msk [vmem:[%s1367_s28 + $0x4c] sm:$0xf] %vm776_vm0, %v966_v3  ;;  %v506_v13 = vadd.f32 %v1358_v24, %v505_v61  ;;  %v964_v14 = vpack.c.bf16 %v633_v11, %v633_v11  ;;  %v622_v15 = vsel %vm558_vm9, %v450_v58, %v590_v8  ;;  %v453_v17 = vadd.f32 %v1026_v1, %v1358_v24 }
 0x134   : > { %v638_v16 = vsel %vm574_vm10, %v514_v59, %v606_v9  ;;  %778 = vst.msk [vmem:[%s1367_s28 + $0x4] sm:$0xf] %vm776_vm0, %v948_v10  ;;  %v953_v18 = vpack.c.bf16 %v622_v15, %v622_v15  ;;  %vm556_vm11 = vcmp.ge.f32.partialorder %v442_v12, 0.0  ;;  %v588_v20 = vmul.f32 0.2, %v442_v12 }
 0x135   : > { %v969_v19 = vpack.c.bf16 %v638_v16, %v638_v16  ;;  %794 = vst.msk [vmem:[%s1367_s28 + $0x44] sm:$0xf] %vm776_vm0, %v964_v14  ;;  %vm572_vm12 = vcmp.ge.f32.partialorder %v506_v13, 0.0  ;;  %v604_v21 = vmul.f32 0.2, %v506_v13  ;;  %vm559_vm13 = vcmp.ge.f32.partialorder %v453_v17, 0.0 }
 0x136   : > { %v591_v22 = vmul.f32 0.2, %v453_v17  ;;  %783 = vst.msk [vmem:[%s1367_s28 + $0x18] sm:$0xf] %vm776_vm0, %v953_v18  ;;  %v620_v23 = vsel %vm556_vm11, %v442_v12, %v588_v20  ;;  %v517_v25 = vadd.f32 %v1042_v2, %v1358_v24  ;;  %v445_v26 = vadd.f32 %v1358_v24, %v444_v5  ;;  %v1029_v28 = vpop.f32.mrb[8].mxu0  ;;  %v1045_v29 = vpop.f32.mrb[8].mxu1 }
 0x137   : > { %799 = vst.msk [vmem:[%s1367_s28 + $0x58] sm:$0xf] %vm776_vm0, %v969_v19  ;;  %v509_v27 = vadd.f32 %v1358_v24, %v508_v6  ;;  %v951_v30 = vpack.c.bf16 %v620_v23, %v620_v23  ;;  %v636_v31 = vsel %vm572_vm12, %v506_v13, %v604_v21  ;;  %v466_v33 = vadd.f32 %v1029_v28, %v1358_v24  ;;  %v457_v34 = vpop.f32.mrb[9].mxu0  ;;  %v521_v35 = vpop.f32.mrb[9].mxu1 }
 0x138   : > { %v623_v32 = vsel %vm559_vm13, %v453_v17, %v591_v22  ;;  %v967_v36 = vpack.c.bf16 %v636_v31, %v636_v31  ;;  %vm575_vm14 = vcmp.ge.f32.partialorder %v517_v25, 0.0  ;;  %v607_v38 = vmul.f32 0.2, %v517_v25  ;;  %v1030_v39 = vpop.f32.mrb[10].mxu0  ;;  %v1046_v40 = vpop.f32.mrb[10].mxu1 }
 0x139   : > { %v954_v37 = vpack.c.bf16 %v623_v32, %v623_v32  ;;  %781 = vst.msk [vmem:[%s1367_s28 + $0x10] sm:$0xf] %vm776_vm0, %v951_v30  ;;  %vm557_vm15 = vcmp.ge.f32.partialorder %v445_v26, 0.0  ;;  %v589_v41 = vmul.f32 0.2, %v445_v26  ;;  %vm573_vm1 = vcmp.ge.f32.partialorder %v509_v27, 0.0 }
 0x13a   : > { %v605_v42 = vmul.f32 0.2, %v509_v27  ;;  %797 = vst.msk [vmem:[%s1367_s28 + $0x50] sm:$0xf] %vm776_vm0, %v967_v36  ;;  %v639_v43 = vsel %vm575_vm14, %v517_v25, %v607_v38  ;;  %vm562_vm2 = vcmp.ge.f32.partialorder %v466_v33, 0.0  ;;  %v530_v45 = vadd.f32 %v1045_v29, %v1358_v24  ;;  %v460_v46 = vpop.f32.mrb[11].mxu0 }
 0x13b   : > { %784 = vst.msk [vmem:[%s1367_s28 + $0x1c] sm:$0xf] %vm776_vm0, %v954_v37  ;;  %v594_v44 = vmul.f32 0.2, %v466_v33  ;;  %v524_v47 = vpop.f32.mrb[11].mxu1  ;;  %v970_v48 = vpack.c.bf16 %v639_v43, %v639_v43  ;;  %v621_v49 = vsel %vm557_vm15, %v445_v26, %v589_v41  ;;  %v458_v51 = vadd.f32 %v1358_v24, %v457_v34 }
 0x13c   : > { %v637_v50 = vsel %vm573_vm1, %v509_v27, %v605_v42  ;;  %v952_v52 = vpack.c.bf16 %v621_v49, %v621_v49  ;;  %vm578_vm3 = vcmp.ge.f32.partialorder %v530_v45, 0.0  ;;  %v610_v56 = vmul.f32 0.2, %v530_v45 }
 0x13d   : > { %v968_v53 = vpack.c.bf16 %v637_v50, %v637_v50  ;;  %v626_v54 = vsel %vm562_vm2, %v466_v33, %v594_v44  ;;  %800 = vst.msk [vmem:[%s1367_s28 + $0x5c] sm:$0xf] %vm776_vm0, %v970_v48  ;;  %vm560_vm4 = vcmp.ge.f32.partialorder %v458_v51, 0.0  ;;  %v592_v57 = vmul.f32 0.2, %v458_v51  ;;  %v1033_v58 = vpop.f32.mrb[12].mxu0 }
 0x13e   : > { %v957_v55 = vpack.c.bf16 %v626_v54, %v626_v54  ;;  %782 = vst.msk [vmem:[%s1367_s28 + $0x14] sm:$0xf] %vm776_vm0, %v952_v52  ;;  %v522_v59 = vadd.f32 %v1358_v24, %v521_v35  ;;  %v469_v60 = vadd.f32 %v1030_v39, %v1358_v24  ;;  %v533_v61 = vadd.f32 %v1046_v40, %v1358_v24  ;;  %v1049_v63 = vpop.f32.mrb[12].mxu1  ;;  %v473_v0 = vpop.f32.mrb[13].mxu0 }
 0x13f   : > { %798 = vst.msk [vmem:[%s1367_s28 + $0x54] sm:$0xf] %vm776_vm0, %v968_v53  ;;  %v461_v62 = vadd.f32 %v1358_v24, %v460_v46  ;;  %v642_v1 = vsel %vm578_vm3, %v530_v45, %v610_v56  ;;  %v624_v2 = vsel %vm560_vm4, %v458_v51, %v592_v57  ;;  %v525_v3 = vadd.f32 %v1358_v24, %v524_v47  ;;  %v537_v5 = vpop.f32.mrb[13].mxu1  ;;  %v1034_v6 = vpop.f32.mrb[14].mxu0 }
 0x140   : > { %787 = vst.msk [vmem:[%s1367_s28 + $0x28] sm:$0xf] %vm776_vm0, %v957_v55  ;;  %v482_v4 = vadd.f32 %v1033_v58, %v1358_v24  ;;  %v973_v7 = vpack.c.bf16 %v642_v1, %v642_v1  ;;  %v955_v8 = vpack.c.bf16 %v624_v2, %v624_v2  ;;  %vm576_vm5 = vcmp.ge.f32.partialorder %v522_v59, 0.0  ;;  %v1050_v10 = vpop.f32.mrb[14].mxu1  ;;  %v476_v11 = vpop.f32.mrb[15].mxu0 }
 0x141   : > { %v608_v9 = vmul.f32 0.2, %v522_v59  ;;  %vm563_vm6 = vcmp.ge.f32.partialorder %v469_v60, 0.0  ;;  %v595_v12 = vmul.f32 0.2, %v469_v60  ;;  %vm579_vm7 = vcmp.ge.f32.partialorder %v533_v61, 0.0 }
 0x142   : > { %v611_v13 = vmul.f32 0.2, %v533_v61  ;;  %803 = vst.msk [vmem:[%s1367_s28 + $0x68] sm:$0xf] %vm776_vm0, %v973_v7  ;;  %785 = vst.msk [vmem:[%s1367_s28 + $0x20] sm:$0xf] %vm776_vm0, %v955_v8  ;;  %v546_v28 = vadd.f32 %v1049_v63, %v1358_v24  ;;  %v474_v30 = vadd.f32 %v1358_v24, %v473_v0  ;;  %v538_v31 = vadd.f32 %v1358_v24, %v537_v5 }
 0x143   : > { %v640_v14 = vsel %vm576_vm5, %v522_v59, %v608_v9  ;;  %vm561_vm8 = vcmp.ge.f32.partialorder %v461_v62, 0.0  ;;  %v593_v15 = vmul.f32 0.2, %v461_v62  ;;  %vm577_vm9 = vcmp.ge.f32.partialorder %v525_v3, 0.0  ;;  %v540_v16 = vpop.f32.mrb[15].mxu1 }
 0x144   : > { %v971_v17 = vpack.c.bf16 %v640_v14, %v640_v14  ;;  %v627_v18 = vsel %vm563_vm6, %v469_v60, %v595_v12  ;;  %v643_v19 = vsel %vm579_vm7, %v533_v61, %v611_v13  ;;  %v609_v20 = vmul.f32 0.2, %v525_v3 }
 0x145   : > { %v958_v21 = vpack.c.bf16 %v627_v18, %v627_v18  ;;  %v974_v22 = vpack.c.bf16 %v643_v19, %v643_v19  ;;  %v625_v23 = vsel %vm561_vm8, %v461_v62, %v593_v15  ;;  %vm566_vm10 = vcmp.ge.f32.partialorder %v482_v4, 0.0 }
 0x146   : > { %801 = vst.msk [vmem:[%s1367_s28 + $0x60] sm:$0xf] %vm776_vm0, %v971_v17  ;;  %v956_v25 = vpack.c.bf16 %v625_v23, %v625_v23  ;;  %v641_v26 = vsel %vm577_vm9, %v525_v3, %v609_v20  ;;  %v598_v27 = vmul.f32 0.2, %v482_v4  ;;  %v485_v32 = vadd.f32 %v1034_v6, %v1358_v24 }
 0x147   : > { %788 = vst.msk [vmem:[%s1367_s28 + $0x2c] sm:$0xf] %vm776_vm0, %v958_v21  ;;  %804 = vst.msk [vmem:[%s1367_s28 + $0x6c] sm:$0xf] %vm776_vm0, %v974_v22  ;;  %v972_v29 = vpack.c.bf16 %v641_v26, %v641_v26  ;;  %vm582_vm11 = vcmp.ge.f32.partialorder %v546_v28, 0.0  ;;  %v549_v35 = vadd.f32 %v1050_v10, %v1358_v24  ;;  %vm564_vm12 = vcmp.ge.f32.partialorder %v474_v30, 0.0 }
 0x148   : > { %786 = vst.msk [vmem:[%s1367_s28 + $0x24] sm:$0xf] %vm776_vm0, %v956_v25  ;;  %v630_v33 = vsel %vm566_vm10, %v482_v4, %v598_v27  ;;  %v614_v34 = vmul.f32 0.2, %v546_v28  ;;  %v596_v37 = vmul.f32 0.2, %v474_v30  ;;  %v477_v47 = vadd.f32 %v1358_v24, %v476_v11 }
 0x149   : > { %802 = vst.msk [vmem:[%s1367_s28 + $0x64] sm:$0xf] %vm776_vm0, %v972_v29  ;;  %v961_v36 = vpack.c.bf16 %v630_v33, %v630_v33  ;;  %vm580_vm13 = vcmp.ge.f32.partialorder %v538_v31, 0.0  ;;  %v612_v39 = vmul.f32 0.2, %v538_v31  ;;  %vm567_vm14 = vcmp.ge.f32.partialorder %v485_v32, 0.0 }
 0x14a   : > { %v646_v38 = vsel %vm582_vm11, %v546_v28, %v614_v34  ;;  %v599_v40 = vmul.f32 0.2, %v485_v32  ;;  %v628_v42 = vsel %vm564_vm12, %v474_v30, %v596_v37  ;;  %vm583_vm15 = vcmp.ge.f32.partialorder %v549_v35, 0.0 }
 0x14b   : > { %791 = vst.msk [vmem:[%s1367_s28 + $0x38] sm:$0xf] %vm776_vm0, %v961_v36  ;;  %v977_v41 = vpack.c.bf16 %v646_v38, %v646_v38  ;;  %v615_v43 = vmul.f32 0.2, %v549_v35  ;;  %v959_v44 = vpack.c.bf16 %v628_v42, %v628_v42  ;;  %v644_v45 = vsel %vm580_vm13, %v538_v31, %v612_v39 }
 0x14c   : > { %v631_v46 = vsel %vm567_vm14, %v485_v32, %v599_v40  ;;  %v975_v48 = vpack.c.bf16 %v644_v45, %v644_v45  ;;  %v541_v51 = vadd.f32 %v1358_v24, %v540_v16  ;;  %vm565_vm1 = vcmp.ge.f32.partialorder %v477_v47, 0.0 }
 0x14d   : > { %807 = vst.msk [vmem:[%s1367_s28 + $0x78] sm:$0xf] %vm776_vm0, %v977_v41  ;;  %v962_v49 = vpack.c.bf16 %v631_v46, %v631_v46  ;;  %v647_v50 = vsel %vm583_vm15, %v549_v35, %v615_v43  ;;  %789 = vst.msk [vmem:[%s1367_s28 + $0x30] sm:$0xf] %vm776_vm0, %v959_v44  ;;  %v597_v53 = vmul.f32 0.2, %v477_v47 }
 0x14e   : > { %v978_v52 = vpack.c.bf16 %v647_v50, %v647_v50  ;;  %805 = vst.msk [vmem:[%s1367_s28 + $0x70] sm:$0xf] %vm776_vm0, %v975_v48  ;;  %vm581_vm2 = vcmp.ge.f32.partialorder %v541_v51, 0.0  ;;  %v613_v54 = vmul.f32 0.2, %v541_v51 }
 0x14f   : > { %792 = vst.msk [vmem:[%s1367_s28 + $0x3c] sm:$0xf] %vm776_vm0, %v962_v49  ;;  %v629_v55 = vsel %vm565_vm1, %v477_v47, %v597_v53 }
 0x150   : > { %808 = vst.msk [vmem:[%s1367_s28 + $0x7c] sm:$0xf] %vm776_vm0, %v978_v52  ;;  %v960_v56 = vpack.c.bf16 %v629_v55, %v629_v55  ;;  %v645_v57 = vsel %vm581_vm2, %v541_v51, %v613_v54 }
 0x151   : > { %v976_v58 = vpack.c.bf16 %v645_v57, %v645_v57 }
 0x152   : > { %790 = vst.msk [vmem:[%s1367_s28 + $0x34] sm:$0xf] %vm776_vm0, %v960_v56 }
 0x153   : > { %806 = vst.msk [vmem:[%s1367_s28 + $0x74] sm:$0xf] %vm776_vm0, %v976_v58 }
 0x154 PF: > { %p13_p8 = scmp.ge.s32.totalorder %s1243_s17, 4   ;;  %s1482_s12 = smov %s1188_s13 }
 0x155   : > { %s1483_s13 = smov %s1192_s14  ;;  %s1484_s14 = smov %s1253_s20 }
 0x156   : > { %s1485_s15 = smov %s1243_s17  ;;  %15 = sbr.rel (!%p13_p8) target bundleno = 3 (0x3), region = 72 }
 0x15d   :  { %830 = vsyncpa [#allocation3], 1 }
 0x15e   :  { %832 = vsyncpa [#allocation3 + $0x1], 1 }

</bundles_post_ra>
